<compile_context>
chip_gen: v5e
topology: v5e:2x2
jax: 0.10.0
libtpu: 0.0.40
codegen_flags: <defaults>
</compile_context>

<pallas_src>
import jax
import jax.numpy as jnp
import numpy as np
from jax.experimental import pallas as pl
from jax.experimental.pallas import tpu as pltpu

LN_EPS = 1e-5  # PyTorch LayerNorm default


def _layernorm(x, w, b):
    mu = jnp.mean(x, axis=-1, keepdims=True)
    var = jnp.mean((x - mu) ** 2, axis=-1, keepdims=True)
    return (x - mu) * jax.lax.rsqrt(var + LN_EPS) * w + b


def _layernorm_noaffine(x):
    mu = jnp.mean(x, axis=-1, keepdims=True)
    var = jnp.mean((x - mu) ** 2, axis=-1, keepdims=True)
    return (x - mu) * jax.lax.rsqrt(var + LN_EPS)


def mamba_kernel(x_ref, ewT_ref, eb_ref,
                 AT_ref, W_ref, bias_ref, CP_ref,
                 fw_ref, fb_ref,
                 out_ref,
                 h_scratch):
    # x_ref:     (S, B, Din)   time-major so per-step slices are leading-axis
    # ewT_ref:   (Din, dm)     embed weight, pre-transposed
    # AT_ref:    (L, ds, ds)   A^T
    # W_ref:     (L, dm, ds+dm)  fused [ diag(nw) B^T | diag(nw) D^T pw^T ]
    # bias_ref:  (L, ds+dm)      fused [ nb B^T | nb D^T pw^T + pb ]
    # CP_ref:    (L, ds, dm)     C^T pw^T  (proj folded)
    # out_ref:   (B, dm)
    # h_scratch: (S, B, ds)      VMEM hidden-state buffer
    S, Bsz, Din = x_ref.shape
    L, ds_, dm = CP_ref.shape
    rows = S * Bsz

    # embed: all time*batch rows in one matmul
    x2 = x_ref[...].reshape(rows, Din)
    xcur = jnp.dot(x2, ewT_ref[...], preferred_element_type=jnp.float32) + eb_ref[...]

    for l in range(L):                      # static unroll over layers (L small)
        residual = xcur
        xhat = _layernorm_noaffine(xcur)    # affine folded into W/bias wrapper-side

        # One fused shared-LHS matmul per layer:
        #   z[:, :ds] = B @ u_t                      (recurrence drive)
        #   z[:, ds:] = (D @ u_t) @ pw^T + pb        (proj-folded skip path)
        z = jnp.dot(xhat, W_ref[l], preferred_element_type=jnp.float32) + bias_ref[l:l + 1, :]
        bu3 = z[:, :ds_].reshape(S, Bsz, ds_)
        yD = z[:, ds_:]

        AT = AT_ref[l]                      # (ds, ds), hoisted out of the t-loop
        # Serial recurrence -- the only thing on the critical path.
        # t = 0: h starts at zero, so the A-matmul is skipped entirely.
        h = jnp.tanh(bu3[0])
        h_scratch[0] = h
        for t in range(1, S):               # static unroll; S small here
            h = jnp.tanh(jnp.dot(h, AT, preferred_element_type=jnp.float32) + bu3[t])
            h_scratch[t] = h
        # TODO(synk): for large S switch to lax.fori_loop(..., unroll=True) and/or keep AT
        # resident in MXU weight regs via pltpu.matmul_push_rhs.

        H = h_scratch[...].reshape(rows, ds_)
        # Hoisted, proj-folded output: (C h + D u) @ pw^T + pb = H @ CP + yD
        xcur = jnp.dot(H, CP_ref[l], preferred_element_type=jnp.float32) + yD + residual
        # TODO(synk): nn.Dropout(p) is identity in eval mode; stochastic dropout not emitted.

    # final LayerNorm + mean over the (leading) time axis
    xn = _layernorm(xcur, fw_ref[...], fb_ref[...])
    out_ref[...] = jnp.mean(xn.reshape(S, Bsz, dm), axis=0)


def mamba_pallas(x, p):
    Bsz, S, Din = x.shape
    dm = p['embed_w'].shape[0]
    L, ds_, _ = p['A'].shape

    # ---- wrapper-side weight algebra (one-time, keeps the kernel transpose-free) ----
    ewT = p['embed_w'].T                          # (Din, dm)
    AT = jnp.swapaxes(p['A'], -1, -2)             # (L, ds, ds)
    BT = jnp.swapaxes(p['B'], -1, -2)             # (L, dm, ds)
    CT = jnp.swapaxes(p['C'], -1, -2)             # (L, ds, dm)
    DT = jnp.swapaxes(p['D'], -1, -2)             # (L, dm, dm)
    pwT = jnp.swapaxes(p['proj_w'], -1, -2)       # (L, dm, dm)

    # Fold the output projection into the C/D paths:  y @ pwT = h @ (CT pwT) + u @ (DT pwT)
    CP = jnp.matmul(CT, pwT)                      # (L, ds, dm)
    DP = jnp.matmul(DT, pwT)                      # (L, dm, dm)

    # Fold the per-layer LayerNorm affine into the downstream weights:  u = xhat*nw + nb
    nw, nb = p['norm_w'], p['norm_b']             # (L, dm)
    BT_s = nw[:, :, None] * BT                    # (L, dm, ds)
    DP_s = nw[:, :, None] * DP                    # (L, dm, dm)
    W = jnp.concatenate([BT_s, DP_s], axis=-1)    # (L, dm, ds+dm)  fused shared-LHS weight
    bias_bu = jnp.einsum('ld,lds->ls', nb, BT)                  # (L, ds)
    bias_yd = jnp.einsum('ld,lde->le', nb, DP) + p['proj_b']    # (L, dm)
    bias = jnp.concatenate([bias_bu, bias_yd], axis=-1)         # (L, ds+dm)

    # Time-major input so the serial loop slices the leading axis.
    xt = jnp.transpose(x, (1, 0, 2))              # (S, B, Din)

    rows = Bsz * S
    flops = (2 * rows * Din * dm                              # embed
             + L * (2 * rows * dm * (ds_ + dm)                # fused [B | D.pw] matmul
                    + 2 * rows * ds_ * ds_                    # recurrence h @ A^T
                    + 2 * rows * ds_ * dm))                   # H @ (C^T pw^T)
    transcendentals = L * rows * ds_ + (L + 1) * rows         # tanh + rsqrt
    bytes_accessed = 4 * int(xt.size + ewT.size + p['embed_b'].size + AT.size
                             + W.size + bias.size + CP.size
                             + p['fnorm_w'].size + p['fnorm_b'].size + Bsz * dm)

    # Single invocation: the whole problem fits comfortably in VMEM at these sizes.
    # At realistic sizes (dm >= 1024, L >= 8): stream L as an "arbitrary" grid axis with
    # per-layer weight BlockSpecs (esp. for 64 MiB v7x VMEM) and add a leading "parallel"
    # batch axis to use both v7x TensorCores.
    n_in = 9
    out = pl.pallas_call(
        mamba_kernel,
        out_shape=jax.ShapeDtypeStruct((Bsz, dm), jnp.float32),
        in_specs=[pl.BlockSpec(memory_space=pltpu.MemorySpace.VMEM)] * n_in,
        out_specs=pl.BlockSpec(memory_space=pltpu.MemorySpace.VMEM),
        scratch_shapes=[pltpu.VMEM((S, Bsz, ds_), jnp.float32)],
        compiler_params=pltpu.CompilerParams(vmem_limit_bytes=32 * 1024 * 1024),
        cost_estimate=pl.CostEstimate(flops=flops,
                                      transcendentals=transcendentals,
                                      bytes_accessed=bytes_accessed),
    )(xt, ewT, p['embed_b'], AT, W, bias, CP, p['fnorm_w'], p['fnorm_b'])
    return out                                    # (B, dm)


def mamba_ref(x, p):
    """Pure-JAX reference mirroring the PyTorch forward (eval mode)."""
    h = jnp.einsum('bsi,oi->bso', x, p['embed_w']) + p['embed_b'][0]
    L = p['A'].shape[0]
    for l in range(L):
        res = h
        xn = _layernorm(h, p['norm_w'][l], p['norm_b'][l])
        A, Bm, C, D = p['A'][l], p['B'][l], p['C'][l], p['D'][l]
        Bsz, S, dm = xn.shape
        ds_ = A.shape[0]
        st = jnp.zeros((Bsz, ds_), jnp.float32)
        ys = []
        for t in range(S):
            u = xn[:, t, :]
            st = jnp.tanh(st @ A.T + u @ Bm.T)
            ys.append(st @ C.T + u @ D.T)
        y = jnp.stack(ys, axis=1)
        y = jnp.einsum('bsd,ed->bse', y, p['proj_w'][l]) + p['proj_b'][l]
        h = y + res
    h = _layernorm(h, p['fnorm_w'][0], p['fnorm_b'][0])
    return h.mean(axis=1)


if __name__ == "__main__":
    # Mamba(input_dim=16, output_dim=32, d_state=8, num_layers=2)
    B, S, Din, dm, ds_, L = 2, 8, 16, 32, 8, 2

    key = jax.random.PRNGKey(0)
    ks = jax.random.split(key, 14)
    params = {
        'embed_w': (jax.random.normal(ks[0], (dm, Din)) * 0.1).astype(jnp.float32),
        'embed_b': (jax.random.normal(ks[1], (1, dm)) * 0.1).astype(jnp.float32),
        # non-trivial LayerNorm affine so the wrapper-side fold is actually exercised
        'norm_w': (1.0 + 0.1 * jax.random.normal(ks[2], (L, dm))).astype(jnp.float32),
        'norm_b': (0.1 * jax.random.normal(ks[3], (L, dm))).astype(jnp.float32),
        'A': jax.random.normal(ks[4], (L, ds_, ds_), jnp.float32),
        'B': jax.random.normal(ks[5], (L, ds_, dm), jnp.float32),
        'C': jax.random.normal(ks[6], (L, dm, ds_), jnp.float32),
        'D': jax.random.normal(ks[7], (L, dm, dm), jnp.float32),
        'proj_w': (jax.random.normal(ks[8], (L, dm, dm)) * 0.1).astype(jnp.float32),
        'proj_b': (jax.random.normal(ks[9], (L, dm)) * 0.1).astype(jnp.float32),
        'fnorm_w': (1.0 + 0.1 * jax.random.normal(ks[10], (1, dm))).astype(jnp.float32),
        'fnorm_b': (0.1 * jax.random.normal(ks[11], (1, dm))).astype(jnp.float32),
    }
    x = jax.random.normal(ks[12], (B, S, Din), jnp.float32)

    out = jax.block_until_ready(mamba_pallas(x, params))
    ref = jax.block_until_ready(mamba_ref(x, params))

    assert out.shape == (B, dm)
    np.testing.assert_allclose(np.asarray(out), np.asarray(ref), rtol=2e-4, atol=2e-4)
    print("KERNEL_OK")
</pallas_src>

<mosaic_0001>
module attributes {stable_mosaic.version = 11 : i64} {
  func.func @mamba_kernel(%arg0: memref<8x2x16xf32, #tpu.memory_space<vmem>>, %arg1: memref<16x32xf32, #tpu.memory_space<vmem>>, %arg2: memref<1x32xf32, #tpu.memory_space<vmem>>, %arg3: memref<2x8x8xf32, #tpu.memory_space<vmem>>, %arg4: memref<2x32x40xf32, #tpu.memory_space<vmem>>, %arg5: memref<2x40xf32, #tpu.memory_space<vmem>>, %arg6: memref<2x8x32xf32, #tpu.memory_space<vmem>>, %arg7: memref<1x32xf32, #tpu.memory_space<vmem>>, %arg8: memref<1x32xf32, #tpu.memory_space<vmem>>, %arg9: memref<2x32xf32, #tpu.memory_space<vmem>>, %arg10: memref<8x2x8xf32, #tpu.memory_space<vmem>>) attributes {dimension_semantics = [], scalar_prefetch = 0 : i64, scratch_operands = 1 : i64, tpu.core_type = #tpu.core_type<tc>} {
    %c0 = arith.constant 0 : index
    %c0_0 = arith.constant 0 : index
    %c0_1 = arith.constant 0 : index
    %0 = vector.load %arg0[%c0, %c0_0, %c0_1] : memref<8x2x16xf32, #tpu.memory_space<vmem>>, vector<8x2x16xf32>
    %1 = vector.shape_cast %0 : vector<8x2x16xf32> to vector<16x16xf32>
    %c0_2 = arith.constant 0 : index
    %c0_3 = arith.constant 0 : index
    %2 = vector.load %arg1[%c0_2, %c0_3] : memref<16x32xf32, #tpu.memory_space<vmem>>, vector<16x32xf32>
    %cst = arith.constant dense<0.000000e+00> : vector<16x32xf32>
    %3 = tpu.matmul %1, %2, %cst {dimension_numbers = #tpu.dot_dimension_numbers<[1], [0], [0], [1], [0, 0, 1, 1], [], []>} : vector<16x16xf32>, vector<16x32xf32>, vector<16x32xf32> -> vector<16x32xf32>
    %c0_4 = arith.constant 0 : index
    %c0_5 = arith.constant 0 : index
    %4 = vector.load %arg2[%c0_4, %c0_5] : memref<1x32xf32, #tpu.memory_space<vmem>>, vector<1x32xf32>
    %5 = vector.broadcast %4 : vector<1x32xf32> to vector<16x32xf32>
    %6 = arith.addf %3, %5 : vector<16x32xf32>
    %cst_6 = arith.constant dense<0.000000e+00> : vector<16xf32>
    %7 = vector.multi_reduction <add>, %6, %cst_6 [1] : vector<16x32xf32> to vector<16xf32>
    %8 = vector.shape_cast %7 : vector<16xf32> to vector<16x1xf32>
    %cst_7 = arith.constant 3.200000e+01 : f32
    %9 = vector.broadcast %cst_7 : f32 to vector<16x1xf32>
    %10 = arith.divf %8, %9 : vector<16x1xf32>
    %11 = vector.broadcast %10 : vector<16x1xf32> to vector<16x32xf32>
    %12 = arith.subf %6, %11 : vector<16x32xf32>
    %13 = arith.mulf %12, %12 : vector<16x32xf32>
    %cst_8 = arith.constant dense<0.000000e+00> : vector<16xf32>
    %14 = vector.multi_reduction <add>, %13, %cst_8 [1] : vector<16x32xf32> to vector<16xf32>
    %15 = vector.shape_cast %14 : vector<16xf32> to vector<16x1xf32>
    %cst_9 = arith.constant 3.200000e+01 : f32
    %16 = vector.broadcast %cst_9 : f32 to vector<16x1xf32>
    %17 = arith.divf %15, %16 : vector<16x1xf32>
    %18 = vector.broadcast %10 : vector<16x1xf32> to vector<16x32xf32>
    %19 = arith.subf %6, %18 : vector<16x32xf32>
    %cst_10 = arith.constant 9.99999974E-6 : f32
    %20 = vector.broadcast %cst_10 : f32 to vector<16x1xf32>
    %21 = arith.addf %17, %20 : vector<16x1xf32>
    %22 = math.rsqrt %21 : vector<16x1xf32>
    %23 = vector.broadcast %22 : vector<16x1xf32> to vector<16x32xf32>
    %24 = arith.mulf %19, %23 : vector<16x32xf32>
    %c0_11 = arith.constant 0 : index
    %c0_12 = arith.constant 0 : index
    %c0_13 = arith.constant 0 : index
    %25 = vector.load %arg4[%c0_11, %c0_12, %c0_13] : memref<2x32x40xf32, #tpu.memory_space<vmem>>, vector<1x32x40xf32>
    %26 = vector.shape_cast %25 : vector<1x32x40xf32> to vector<32x40xf32>
    %cst_14 = arith.constant dense<0.000000e+00> : vector<16x40xf32>
    %27 = tpu.matmul %24, %26, %cst_14 {dimension_numbers = #tpu.dot_dimension_numbers<[1], [0], [0], [1], [0, 0, 1, 1], [], []>} : vector<16x32xf32>, vector<32x40xf32>, vector<16x40xf32> -> vector<16x40xf32>
    %c0_15 = arith.constant 0 : index
    %c0_16 = arith.constant 0 : index
    %28 = vector.load %arg5[%c0_15, %c0_16] : memref<2x40xf32, #tpu.memory_space<vmem>>, vector<1x40xf32>
    %29 = vector.broadcast %28 : vector<1x40xf32> to vector<16x40xf32>
    %30 = arith.addf %27, %29 : vector<16x40xf32>
    %31 = vector.extract_strided_slice %30 {offsets = [0, 0], sizes = [16, 8], strides = [1, 1]} : vector<16x40xf32> to vector<16x8xf32>
    %32 = vector.shape_cast %31 : vector<16x8xf32> to vector<8x2x8xf32>
    %33 = vector.extract_strided_slice %30 {offsets = [0, 8], sizes = [16, 32], strides = [1, 1]} : vector<16x40xf32> to vector<16x32xf32>
    %c0_17 = arith.constant 0 : index
    %c0_18 = arith.constant 0 : index
    %c0_19 = arith.constant 0 : index
    %34 = vector.load %arg3[%c0_17, %c0_18, %c0_19] : memref<2x8x8xf32, #tpu.memory_space<vmem>>, vector<1x8x8xf32>
    %35 = vector.shape_cast %34 : vector<1x8x8xf32> to vector<8x8xf32>
    %36 = vector.extract_strided_slice %32 {offsets = [0, 0, 0], sizes = [1, 2, 8], strides = [1, 1, 1]} : vector<8x2x8xf32> to vector<1x2x8xf32>
    %37 = vector.shape_cast %36 : vector<1x2x8xf32> to vector<2x8xf32>
    %38 = math.tanh %37 : vector<2x8xf32>
    %c0_20 = arith.constant 0 : index
    %c0_21 = arith.constant 0 : index
    %c0_22 = arith.constant 0 : index
    %39 = vector.load %arg10[%c0_20, %c0_21, %c0_22] : memref<8x2x8xf32, #tpu.memory_space<vmem>>, vector<1x2x8xf32>
    %40 = vector.shape_cast %39 : vector<1x2x8xf32> to vector<2x8xf32>
    %41 = vector.shape_cast %38 : vector<2x8xf32> to vector<1x2x8xf32>
    tpu.vector_store %arg10[%c0_20, %c0_21, %c0_22], %41 {strides = array<i32>} : memref<8x2x8xf32, #tpu.memory_space<vmem>>, vector<1x2x8xf32>,
    %cst_23 = arith.constant dense<0.000000e+00> : vector<2x8xf32>
    %42 = tpu.matmul %38, %35, %cst_23 {dimension_numbers = #tpu.dot_dimension_numbers<[1], [0], [0], [1], [0, 0, 1, 1], [], []>} : vector<2x8xf32>, vector<8x8xf32>, vector<2x8xf32> -> vector<2x8xf32>
    %43 = vector.extract_strided_slice %32 {offsets = [1, 0, 0], sizes = [1, 2, 8], strides = [1, 1, 1]} : vector<8x2x8xf32> to vector<1x2x8xf32>
    %44 = vector.shape_cast %43 : vector<1x2x8xf32> to vector<2x8xf32>
    %45 = arith.addf %42, %44 : vector<2x8xf32>
    %46 = math.tanh %45 : vector<2x8xf32>
    %c1 = arith.constant 1 : index
    %c0_24 = arith.constant 0 : index
    %c0_25 = arith.constant 0 : index
    %47 = vector.load %arg10[%c1, %c0_24, %c0_25] : memref<8x2x8xf32, #tpu.memory_space<vmem>>, vector<1x2x8xf32>
    %48 = vector.shape_cast %47 : vector<1x2x8xf32> to vector<2x8xf32>
    %49 = vector.shape_cast %46 : vector<2x8xf32> to vector<1x2x8xf32>
    tpu.vector_store %arg10[%c1, %c0_24, %c0_25], %49 {strides = array<i32>} : memref<8x2x8xf32, #tpu.memory_space<vmem>>, vector<1x2x8xf32>,
    %cst_26 = arith.constant dense<0.000000e+00> : vector<2x8xf32>
    %50 = tpu.matmul %46, %35, %cst_26 {dimension_numbers = #tpu.dot_dimension_numbers<[1], [0], [0], [1], [0, 0, 1, 1], [], []>} : vector<2x8xf32>, vector<8x8xf32>, vector<2x8xf32> -> vector<2x8xf32>
    %51 = vector.extract_strided_slice %32 {offsets = [2, 0, 0], sizes = [1, 2, 8], strides = [1, 1, 1]} : vector<8x2x8xf32> to vector<1x2x8xf32>
    %52 = vector.shape_cast %51 : vector<1x2x8xf32> to vector<2x8xf32>
    %53 = arith.addf %50, %52 : vector<2x8xf32>
    %54 = math.tanh %53 : vector<2x8xf32>
    %c2 = arith.constant 2 : index
    %c0_27 = arith.constant 0 : index
    %c0_28 = arith.constant 0 : index
    %55 = vector.load %arg10[%c2, %c0_27, %c0_28] : memref<8x2x8xf32, #tpu.memory_space<vmem>>, vector<1x2x8xf32>
    %56 = vector.shape_cast %55 : vector<1x2x8xf32> to vector<2x8xf32>
    %57 = vector.shape_cast %54 : vector<2x8xf32> to vector<1x2x8xf32>
    tpu.vector_store %arg10[%c2, %c0_27, %c0_28], %57 {strides = array<i32>} : memref<8x2x8xf32, #tpu.memory_space<vmem>>, vector<1x2x8xf32>,
    %cst_29 = arith.constant dense<0.000000e+00> : vector<2x8xf32>
    %58 = tpu.matmul %54, %35, %cst_29 {dimension_numbers = #tpu.dot_dimension_numbers<[1], [0], [0], [1], [0, 0, 1, 1], [], []>} : vector<2x8xf32>, vector<8x8xf32>, vector<2x8xf32> -> vector<2x8xf32>
    %59 = vector.extract_strided_slice %32 {offsets = [3, 0, 0], sizes = [1, 2, 8], strides = [1, 1, 1]} : vector<8x2x8xf32> to vector<1x2x8xf32>
    %60 = vector.shape_cast %59 : vector<1x2x8xf32> to vector<2x8xf32>
    %61 = arith.addf %58, %60 : vector<2x8xf32>
    %62 = math.tanh %61 : vector<2x8xf32>
    %c3 = arith.constant 3 : index
    %c0_30 = arith.constant 0 : index
    %c0_31 = arith.constant 0 : index
    %63 = vector.load %arg10[%c3, %c0_30, %c0_31] : memref<8x2x8xf32, #tpu.memory_space<vmem>>, vector<1x2x8xf32>
    %64 = vector.shape_cast %63 : vector<1x2x8xf32> to vector<2x8xf32>
    %65 = vector.shape_cast %62 : vector<2x8xf32> to vector<1x2x8xf32>
    tpu.vector_store %arg10[%c3, %c0_30, %c0_31], %65 {strides = array<i32>} : memref<8x2x8xf32, #tpu.memory_space<vmem>>, vector<1x2x8xf32>,
    %cst_32 = arith.constant dense<0.000000e+00> : vector<2x8xf32>
    %66 = tpu.matmul %62, %35, %cst_32 {dimension_numbers = #tpu.dot_dimension_numbers<[1], [0], [0], [1], [0, 0, 1, 1], [], []>} : vector<2x8xf32>, vector<8x8xf32>, vector<2x8xf32> -> vector<2x8xf32>
    %67 = vector.extract_strided_slice %32 {offsets = [4, 0, 0], sizes = [1, 2, 8], strides = [1, 1, 1]} : vector<8x2x8xf32> to vector<1x2x8xf32>
    %68 = vector.shape_cast %67 : vector<1x2x8xf32> to vector<2x8xf32>
    %69 = arith.addf %66, %68 : vector<2x8xf32>
    %70 = math.tanh %69 : vector<2x8xf32>
    %c4 = arith.constant 4 : index
    %c0_33 = arith.constant 0 : index
    %c0_34 = arith.constant 0 : index
    %71 = vector.load %arg10[%c4, %c0_33, %c0_34] : memref<8x2x8xf32, #tpu.memory_space<vmem>>, vector<1x2x8xf32>
    %72 = vector.shape_cast %71 : vector<1x2x8xf32> to vector<2x8xf32>
    %73 = vector.shape_cast %70 : vector<2x8xf32> to vector<1x2x8xf32>
    tpu.vector_store %arg10[%c4, %c0_33, %c0_34], %73 {strides = array<i32>} : memref<8x2x8xf32, #tpu.memory_space<vmem>>, vector<1x2x8xf32>,
    %cst_35 = arith.constant dense<0.000000e+00> : vector<2x8xf32>
    %74 = tpu.matmul %70, %35, %cst_35 {dimension_numbers = #tpu.dot_dimension_numbers<[1], [0], [0], [1], [0, 0, 1, 1], [], []>} : vector<2x8xf32>, vector<8x8xf32>, vector<2x8xf32> -> vector<2x8xf32>
    %75 = vector.extract_strided_slice %32 {offsets = [5, 0, 0], sizes = [1, 2, 8], strides = [1, 1, 1]} : vector<8x2x8xf32> to vector<1x2x8xf32>
    %76 = vector.shape_cast %75 : vector<1x2x8xf32> to vector<2x8xf32>
    %77 = arith.addf %74, %76 : vector<2x8xf32>
    %78 = math.tanh %77 : vector<2x8xf32>
    %c5 = arith.constant 5 : index
    %c0_36 = arith.constant 0 : index
    %c0_37 = arith.constant 0 : index
    %79 = vector.load %arg10[%c5, %c0_36, %c0_37] : memref<8x2x8xf32, #tpu.memory_space<vmem>>, vector<1x2x8xf32>
    %80 = vector.shape_cast %79 : vector<1x2x8xf32> to vector<2x8xf32>
    %81 = vector.shape_cast %78 : vector<2x8xf32> to vector<1x2x8xf32>
    tpu.vector_store %arg10[%c5, %c0_36, %c0_37], %81 {strides = array<i32>} : memref<8x2x8xf32, #tpu.memory_space<vmem>>, vector<1x2x8xf32>,
    %cst_38 = arith.constant dense<0.000000e+00> : vector<2x8xf32>
    %82 = tpu.matmul %78, %35, %cst_38 {dimension_numbers = #tpu.dot_dimension_numbers<[1], [0], [0], [1], [0, 0, 1, 1], [], []>} : vector<2x8xf32>, vector<8x8xf32>, vector<2x8xf32> -> vector<2x8xf32>
    %83 = vector.extract_strided_slice %32 {offsets = [6, 0, 0], sizes = [1, 2, 8], strides = [1, 1, 1]} : vector<8x2x8xf32> to vector<1x2x8xf32>
    %84 = vector.shape_cast %83 : vector<1x2x8xf32> to vector<2x8xf32>
    %85 = arith.addf %82, %84 : vector<2x8xf32>
    %86 = math.tanh %85 : vector<2x8xf32>
    %c6 = arith.constant 6 : index
    %c0_39 = arith.constant 0 : index
    %c0_40 = arith.constant 0 : index
    %87 = vector.load %arg10[%c6, %c0_39, %c0_40] : memref<8x2x8xf32, #tpu.memory_space<vmem>>, vector<1x2x8xf32>
    %88 = vector.shape_cast %87 : vector<1x2x8xf32> to vector<2x8xf32>
    %89 = vector.shape_cast %86 : vector<2x8xf32> to vector<1x2x8xf32>
    tpu.vector_store %arg10[%c6, %c0_39, %c0_40], %89 {strides = array<i32>} : memref<8x2x8xf32, #tpu.memory_space<vmem>>, vector<1x2x8xf32>,
    %cst_41 = arith.constant dense<0.000000e+00> : vector<2x8xf32>
    %90 = tpu.matmul %86, %35, %cst_41 {dimension_numbers = #tpu.dot_dimension_numbers<[1], [0], [0], [1], [0, 0, 1, 1], [], []>} : vector<2x8xf32>, vector<8x8xf32>, vector<2x8xf32> -> vector<2x8xf32>
    %91 = vector.extract_strided_slice %32 {offsets = [7, 0, 0], sizes = [1, 2, 8], strides = [1, 1, 1]} : vector<8x2x8xf32> to vector<1x2x8xf32>
    %92 = vector.shape_cast %91 : vector<1x2x8xf32> to vector<2x8xf32>
    %93 = arith.addf %90, %92 : vector<2x8xf32>
    %94 = math.tanh %93 : vector<2x8xf32>
    %c7 = arith.constant 7 : index
    %c0_42 = arith.constant 0 : index
    %c0_43 = arith.constant 0 : index
    %95 = vector.load %arg10[%c7, %c0_42, %c0_43] : memref<8x2x8xf32, #tpu.memory_space<vmem>>, vector<1x2x8xf32>
    %96 = vector.shape_cast %95 : vector<1x2x8xf32> to vector<2x8xf32>
    %97 = vector.shape_cast %94 : vector<2x8xf32> to vector<1x2x8xf32>
    tpu.vector_store %arg10[%c7, %c0_42, %c0_43], %97 {strides = array<i32>} : memref<8x2x8xf32, #tpu.memory_space<vmem>>, vector<1x2x8xf32>,
    %c0_44 = arith.constant 0 : index
    %c0_45 = arith.constant 0 : index
    %c0_46 = arith.constant 0 : index
    %98 = vector.load %arg10[%c0_44, %c0_45, %c0_46] : memref<8x2x8xf32, #tpu.memory_space<vmem>>, vector<8x2x8xf32>
    %99 = vector.shape_cast %98 : vector<8x2x8xf32> to vector<16x8xf32>
    %c0_47 = arith.constant 0 : index
    %c0_48 = arith.constant 0 : index
    %c0_49 = arith.constant 0 : index
    %100 = vector.load %arg6[%c0_47, %c0_48, %c0_49] : memref<2x8x32xf32, #tpu.memory_space<vmem>>, vector<1x8x32xf32>
    %101 = vector.shape_cast %100 : vector<1x8x32xf32> to vector<8x32xf32>
    %cst_50 = arith.constant dense<0.000000e+00> : vector<16x32xf32>
    %102 = tpu.matmul %99, %101, %cst_50 {dimension_numbers = #tpu.dot_dimension_numbers<[1], [0], [0], [1], [0, 0, 1, 1], [], []>} : vector<16x8xf32>, vector<8x32xf32>, vector<16x32xf32> -> vector<16x32xf32>
    %103 = arith.addf %102, %33 : vector<16x32xf32>
    %104 = arith.addf %103, %6 : vector<16x32xf32>
    %cst_51 = arith.constant dense<0.000000e+00> : vector<16xf32>
    %105 = vector.multi_reduction <add>, %104, %cst_51 [1] : vector<16x32xf32> to vector<16xf32>
    %106 = vector.shape_cast %105 : vector<16xf32> to vector<16x1xf32>
    %cst_52 = arith.constant 3.200000e+01 : f32
    %107 = vector.broadcast %cst_52 : f32 to vector<16x1xf32>
    %108 = arith.divf %106, %107 : vector<16x1xf32>
    %109 = vector.broadcast %108 : vector<16x1xf32> to vector<16x32xf32>
    %110 = arith.subf %104, %109 : vector<16x32xf32>
    %111 = arith.mulf %110, %110 : vector<16x32xf32>
    %cst_53 = arith.constant dense<0.000000e+00> : vector<16xf32>
    %112 = vector.multi_reduction <add>, %111, %cst_53 [1] : vector<16x32xf32> to vector<16xf32>
    %113 = vector.shape_cast %112 : vector<16xf32> to vector<16x1xf32>
    %cst_54 = arith.constant 3.200000e+01 : f32
    %114 = vector.broadcast %cst_54 : f32 to vector<16x1xf32>
    %115 = arith.divf %113, %114 : vector<16x1xf32>
    %116 = vector.broadcast %108 : vector<16x1xf32> to vector<16x32xf32>
    %117 = arith.subf %104, %116 : vector<16x32xf32>
    %cst_55 = arith.constant 9.99999974E-6 : f32
    %118 = vector.broadcast %cst_55 : f32 to vector<16x1xf32>
    %119 = arith.addf %115, %118 : vector<16x1xf32>
    %120 = math.rsqrt %119 : vector<16x1xf32>
    %121 = vector.broadcast %120 : vector<16x1xf32> to vector<16x32xf32>
    %122 = arith.mulf %117, %121 : vector<16x32xf32>
    %c1_56 = arith.constant 1 : index
    %c0_57 = arith.constant 0 : index
    %c0_58 = arith.constant 0 : index
    %123 = vector.load %arg4[%c1_56, %c0_57, %c0_58] : memref<2x32x40xf32, #tpu.memory_space<vmem>>, vector<1x32x40xf32>
    %124 = vector.shape_cast %123 : vector<1x32x40xf32> to vector<32x40xf32>
    %cst_59 = arith.constant dense<0.000000e+00> : vector<16x40xf32>
    %125 = tpu.matmul %122, %124, %cst_59 {dimension_numbers = #tpu.dot_dimension_numbers<[1], [0], [0], [1], [0, 0, 1, 1], [], []>} : vector<16x32xf32>, vector<32x40xf32>, vector<16x40xf32> -> vector<16x40xf32>
    %c1_60 = arith.constant 1 : index
    %c0_61 = arith.constant 0 : index
    %126 = vector.load %arg5[%c1_60, %c0_61] : memref<2x40xf32, #tpu.memory_space<vmem>>, vector<1x40xf32>
    %127 = vector.broadcast %126 : vector<1x40xf32> to vector<16x40xf32>
    %128 = arith.addf %125, %127 : vector<16x40xf32>
    %129 = vector.extract_strided_slice %128 {offsets = [0, 0], sizes = [16, 8], strides = [1, 1]} : vector<16x40xf32> to vector<16x8xf32>
    %130 = vector.shape_cast %129 : vector<16x8xf32> to vector<8x2x8xf32>
    %131 = vector.extract_strided_slice %128 {offsets = [0, 8], sizes = [16, 32], strides = [1, 1]} : vector<16x40xf32> to vector<16x32xf32>
    %c1_62 = arith.constant 1 : index
    %c0_63 = arith.constant 0 : index
    %c0_64 = arith.constant 0 : index
    %132 = vector.load %arg3[%c1_62, %c0_63, %c0_64] : memref<2x8x8xf32, #tpu.memory_space<vmem>>, vector<1x8x8xf32>
    %133 = vector.shape_cast %132 : vector<1x8x8xf32> to vector<8x8xf32>
    %134 = vector.extract_strided_slice %130 {offsets = [0, 0, 0], sizes = [1, 2, 8], strides = [1, 1, 1]} : vector<8x2x8xf32> to vector<1x2x8xf32>
    %135 = vector.shape_cast %134 : vector<1x2x8xf32> to vector<2x8xf32>
    %136 = math.tanh %135 : vector<2x8xf32>
    %c0_65 = arith.constant 0 : index
    %c0_66 = arith.constant 0 : index
    %c0_67 = arith.constant 0 : index
    %137 = vector.load %arg10[%c0_65, %c0_66, %c0_67] : memref<8x2x8xf32, #tpu.memory_space<vmem>>, vector<1x2x8xf32>
    %138 = vector.shape_cast %137 : vector<1x2x8xf32> to vector<2x8xf32>
    %139 = vector.shape_cast %136 : vector<2x8xf32> to vector<1x2x8xf32>
    tpu.vector_store %arg10[%c0_65, %c0_66, %c0_67], %139 {strides = array<i32>} : memref<8x2x8xf32, #tpu.memory_space<vmem>>, vector<1x2x8xf32>,
    %cst_68 = arith.constant dense<0.000000e+00> : vector<2x8xf32>
    %140 = tpu.matmul %136, %133, %cst_68 {dimension_numbers = #tpu.dot_dimension_numbers<[1], [0], [0], [1], [0, 0, 1, 1], [], []>} : vector<2x8xf32>, vector<8x8xf32>, vector<2x8xf32> -> vector<2x8xf32>
    %141 = vector.extract_strided_slice %130 {offsets = [1, 0, 0], sizes = [1, 2, 8], strides = [1, 1, 1]} : vector<8x2x8xf32> to vector<1x2x8xf32>
    %142 = vector.shape_cast %141 : vector<1x2x8xf32> to vector<2x8xf32>
    %143 = arith.addf %140, %142 : vector<2x8xf32>
    %144 = math.tanh %143 : vector<2x8xf32>
    %c1_69 = arith.constant 1 : index
    %c0_70 = arith.constant 0 : index
    %c0_71 = arith.constant 0 : index
    %145 = vector.load %arg10[%c1_69, %c0_70, %c0_71] : memref<8x2x8xf32, #tpu.memory_space<vmem>>, vector<1x2x8xf32>
    %146 = vector.shape_cast %145 : vector<1x2x8xf32> to vector<2x8xf32>
    %147 = vector.shape_cast %144 : vector<2x8xf32> to vector<1x2x8xf32>
    tpu.vector_store %arg10[%c1_69, %c0_70, %c0_71], %147 {strides = array<i32>} : memref<8x2x8xf32, #tpu.memory_space<vmem>>, vector<1x2x8xf32>,
    %cst_72 = arith.constant dense<0.000000e+00> : vector<2x8xf32>
    %148 = tpu.matmul %144, %133, %cst_72 {dimension_numbers = #tpu.dot_dimension_numbers<[1], [0], [0], [1], [0, 0, 1, 1], [], []>} : vector<2x8xf32>, vector<8x8xf32>, vector<2x8xf32> -> vector<2x8xf32>
    %149 = vector.extract_strided_slice %130 {offsets = [2, 0, 0], sizes = [1, 2, 8], strides = [1, 1, 1]} : vector<8x2x8xf32> to vector<1x2x8xf32>
    %150 = vector.shape_cast %149 : vector<1x2x8xf32> to vector<2x8xf32>
    %151 = arith.addf %148, %150 : vector<2x8xf32>
    %152 = math.tanh %151 : vector<2x8xf32>
    %c2_73 = arith.constant 2 : index
    %c0_74 = arith.constant 0 : index
    %c0_75 = arith.constant 0 : index
    %153 = vector.load %arg10[%c2_73, %c0_74, %c0_75] : memref<8x2x8xf32, #tpu.memory_space<vmem>>, vector<1x2x8xf32>
    %154 = vector.shape_cast %153 : vector<1x2x8xf32> to vector<2x8xf32>
    %155 = vector.shape_cast %152 : vector<2x8xf32> to vector<1x2x8xf32>
    tpu.vector_store %arg10[%c2_73, %c0_74, %c0_75], %155 {strides = array<i32>} : memref<8x2x8xf32, #tpu.memory_space<vmem>>, vector<1x2x8xf32>,
    %cst_76 = arith.constant dense<0.000000e+00> : vector<2x8xf32>
    %156 = tpu.matmul %152, %133, %cst_76 {dimension_numbers = #tpu.dot_dimension_numbers<[1], [0], [0], [1], [0, 0, 1, 1], [], []>} : vector<2x8xf32>, vector<8x8xf32>, vector<2x8xf32> -> vector<2x8xf32>
    %157 = vector.extract_strided_slice %130 {offsets = [3, 0, 0], sizes = [1, 2, 8], strides = [1, 1, 1]} : vector<8x2x8xf32> to vector<1x2x8xf32>
    %158 = vector.shape_cast %157 : vector<1x2x8xf32> to vector<2x8xf32>
    %159 = arith.addf %156, %158 : vector<2x8xf32>
    %160 = math.tanh %159 : vector<2x8xf32>
    %c3_77 = arith.constant 3 : index
    %c0_78 = arith.constant 0 : index
    %c0_79 = arith.constant 0 : index
    %161 = vector.load %arg10[%c3_77, %c0_78, %c0_79] : memref<8x2x8xf32, #tpu.memory_space<vmem>>, vector<1x2x8xf32>
    %162 = vector.shape_cast %161 : vector<1x2x8xf32> to vector<2x8xf32>
    %163 = vector.shape_cast %160 : vector<2x8xf32> to vector<1x2x8xf32>
    tpu.vector_store %arg10[%c3_77, %c0_78, %c0_79], %163 {strides = array<i32>} : memref<8x2x8xf32, #tpu.memory_space<vmem>>, vector<1x2x8xf32>,
    %cst_80 = arith.constant dense<0.000000e+00> : vector<2x8xf32>
    %164 = tpu.matmul %160, %133, %cst_80 {dimension_numbers = #tpu.dot_dimension_numbers<[1], [0], [0], [1], [0, 0, 1, 1], [], []>} : vector<2x8xf32>, vector<8x8xf32>, vector<2x8xf32> -> vector<2x8xf32>
    %165 = vector.extract_strided_slice %130 {offsets = [4, 0, 0], sizes = [1, 2, 8], strides = [1, 1, 1]} : vector<8x2x8xf32> to vector<1x2x8xf32>
    %166 = vector.shape_cast %165 : vector<1x2x8xf32> to vector<2x8xf32>
    %167 = arith.addf %164, %166 : vector<2x8xf32>
    %168 = math.tanh %167 : vector<2x8xf32>
    %c4_81 = arith.constant 4 : index
    %c0_82 = arith.constant 0 : index
    %c0_83 = arith.constant 0 : index
    %169 = vector.load %arg10[%c4_81, %c0_82, %c0_83] : memref<8x2x8xf32, #tpu.memory_space<vmem>>, vector<1x2x8xf32>
    %170 = vector.shape_cast %169 : vector<1x2x8xf32> to vector<2x8xf32>
    %171 = vector.shape_cast %168 : vector<2x8xf32> to vector<1x2x8xf32>
    tpu.vector_store %arg10[%c4_81, %c0_82, %c0_83], %171 {strides = array<i32>} : memref<8x2x8xf32, #tpu.memory_space<vmem>>, vector<1x2x8xf32>,
    %cst_84 = arith.constant dense<0.000000e+00> : vector<2x8xf32>
    %172 = tpu.matmul %168, %133, %cst_84 {dimension_numbers = #tpu.dot_dimension_numbers<[1], [0], [0], [1], [0, 0, 1, 1], [], []>} : vector<2x8xf32>, vector<8x8xf32>, vector<2x8xf32> -> vector<2x8xf32>
    %173 = vector.extract_strided_slice %130 {offsets = [5, 0, 0], sizes = [1, 2, 8], strides = [1, 1, 1]} : vector<8x2x8xf32> to vector<1x2x8xf32>
    %174 = vector.shape_cast %173 : vector<1x2x8xf32> to vector<2x8xf32>
    %175 = arith.addf %172, %174 : vector<2x8xf32>
    %176 = math.tanh %175 : vector<2x8xf32>
    %c5_85 = arith.constant 5 : index
    %c0_86 = arith.constant 0 : index
    %c0_87 = arith.constant 0 : index
    %177 = vector.load %arg10[%c5_85, %c0_86, %c0_87] : memref<8x2x8xf32, #tpu.memory_space<vmem>>, vector<1x2x8xf32>
    %178 = vector.shape_cast %177 : vector<1x2x8xf32> to vector<2x8xf32>
    %179 = vector.shape_cast %176 : vector<2x8xf32> to vector<1x2x8xf32>
    tpu.vector_store %arg10[%c5_85, %c0_86, %c0_87], %179 {strides = array<i32>} : memref<8x2x8xf32, #tpu.memory_space<vmem>>, vector<1x2x8xf32>,
    %cst_88 = arith.constant dense<0.000000e+00> : vector<2x8xf32>
    %180 = tpu.matmul %176, %133, %cst_88 {dimension_numbers = #tpu.dot_dimension_numbers<[1], [0], [0], [1], [0, 0, 1, 1], [], []>} : vector<2x8xf32>, vector<8x8xf32>, vector<2x8xf32> -> vector<2x8xf32>
    %181 = vector.extract_strided_slice %130 {offsets = [6, 0, 0], sizes = [1, 2, 8], strides = [1, 1, 1]} : vector<8x2x8xf32> to vector<1x2x8xf32>
    %182 = vector.shape_cast %181 : vector<1x2x8xf32> to vector<2x8xf32>
    %183 = arith.addf %180, %182 : vector<2x8xf32>
    %184 = math.tanh %183 : vector<2x8xf32>
    %c6_89 = arith.constant 6 : index
    %c0_90 = arith.constant 0 : index
    %c0_91 = arith.constant 0 : index
    %185 = vector.load %arg10[%c6_89, %c0_90, %c0_91] : memref<8x2x8xf32, #tpu.memory_space<vmem>>, vector<1x2x8xf32>
    %186 = vector.shape_cast %185 : vector<1x2x8xf32> to vector<2x8xf32>
    %187 = vector.shape_cast %184 : vector<2x8xf32> to vector<1x2x8xf32>
    tpu.vector_store %arg10[%c6_89, %c0_90, %c0_91], %187 {strides = array<i32>} : memref<8x2x8xf32, #tpu.memory_space<vmem>>, vector<1x2x8xf32>,
    %cst_92 = arith.constant dense<0.000000e+00> : vector<2x8xf32>
    %188 = tpu.matmul %184, %133, %cst_92 {dimension_numbers = #tpu.dot_dimension_numbers<[1], [0], [0], [1], [0, 0, 1, 1], [], []>} : vector<2x8xf32>, vector<8x8xf32>, vector<2x8xf32> -> vector<2x8xf32>
    %189 = vector.extract_strided_slice %130 {offsets = [7, 0, 0], sizes = [1, 2, 8], strides = [1, 1, 1]} : vector<8x2x8xf32> to vector<1x2x8xf32>
    %190 = vector.shape_cast %189 : vector<1x2x8xf32> to vector<2x8xf32>
    %191 = arith.addf %188, %190 : vector<2x8xf32>
    %192 = math.tanh %191 : vector<2x8xf32>
    %c7_93 = arith.constant 7 : index
    %c0_94 = arith.constant 0 : index
    %c0_95 = arith.constant 0 : index
    %193 = vector.load %arg10[%c7_93, %c0_94, %c0_95] : memref<8x2x8xf32, #tpu.memory_space<vmem>>, vector<1x2x8xf32>
    %194 = vector.shape_cast %193 : vector<1x2x8xf32> to vector<2x8xf32>
    %195 = vector.shape_cast %192 : vector<2x8xf32> to vector<1x2x8xf32>
    tpu.vector_store %arg10[%c7_93, %c0_94, %c0_95], %195 {strides = array<i32>} : memref<8x2x8xf32, #tpu.memory_space<vmem>>, vector<1x2x8xf32>,
    %c0_96 = arith.constant 0 : index
    %c0_97 = arith.constant 0 : index
    %c0_98 = arith.constant 0 : index
    %196 = vector.load %arg10[%c0_96, %c0_97, %c0_98] : memref<8x2x8xf32, #tpu.memory_space<vmem>>, vector<8x2x8xf32>
    %197 = vector.shape_cast %196 : vector<8x2x8xf32> to vector<16x8xf32>
    %c1_99 = arith.constant 1 : index
    %c0_100 = arith.constant 0 : index
    %c0_101 = arith.constant 0 : index
    %198 = vector.load %arg6[%c1_99, %c0_100, %c0_101] : memref<2x8x32xf32, #tpu.memory_space<vmem>>, vector<1x8x32xf32>
    %199 = vector.shape_cast %198 : vector<1x8x32xf32> to vector<8x32xf32>
    %cst_102 = arith.constant dense<0.000000e+00> : vector<16x32xf32>
    %200 = tpu.matmul %197, %199, %cst_102 {dimension_numbers = #tpu.dot_dimension_numbers<[1], [0], [0], [1], [0, 0, 1, 1], [], []>} : vector<16x8xf32>, vector<8x32xf32>, vector<16x32xf32> -> vector<16x32xf32>
    %201 = arith.addf %200, %131 : vector<16x32xf32>
    %202 = arith.addf %201, %104 : vector<16x32xf32>
    %c0_103 = arith.constant 0 : index
    %c0_104 = arith.constant 0 : index
    %203 = vector.load %arg7[%c0_103, %c0_104] : memref<1x32xf32, #tpu.memory_space<vmem>>, vector<1x32xf32>
    %c0_105 = arith.constant 0 : index
    %c0_106 = arith.constant 0 : index
    %204 = vector.load %arg8[%c0_105, %c0_106] : memref<1x32xf32, #tpu.memory_space<vmem>>, vector<1x32xf32>
    %cst_107 = arith.constant dense<0.000000e+00> : vector<16xf32>
    %205 = vector.multi_reduction <add>, %202, %cst_107 [1] : vector<16x32xf32> to vector<16xf32>
    %206 = vector.shape_cast %205 : vector<16xf32> to vector<16x1xf32>
    %cst_108 = arith.constant 3.200000e+01 : f32
    %207 = vector.broadcast %cst_108 : f32 to vector<16x1xf32>
    %208 = arith.divf %206, %207 : vector<16x1xf32>
    %209 = vector.broadcast %208 : vector<16x1xf32> to vector<16x32xf32>
    %210 = arith.subf %202, %209 : vector<16x32xf32>
    %211 = arith.mulf %210, %210 : vector<16x32xf32>
    %cst_109 = arith.constant dense<0.000000e+00> : vector<16xf32>
    %212 = vector.multi_reduction <add>, %211, %cst_109 [1] : vector<16x32xf32> to vector<16xf32>
    %213 = vector.shape_cast %212 : vector<16xf32> to vector<16x1xf32>
    %cst_110 = arith.constant 3.200000e+01 : f32
    %214 = vector.broadcast %cst_110 : f32 to vector<16x1xf32>
    %215 = arith.divf %213, %214 : vector<16x1xf32>
    %216 = vector.broadcast %208 : vector<16x1xf32> to vector<16x32xf32>
    %217 = arith.subf %202, %216 : vector<16x32xf32>
    %cst_111 = arith.constant 9.99999974E-6 : f32
    %218 = vector.broadcast %cst_111 : f32 to vector<16x1xf32>
    %219 = arith.addf %215, %218 : vector<16x1xf32>
    %220 = math.rsqrt %219 : vector<16x1xf32>
    %221 = vector.broadcast %220 : vector<16x1xf32> to vector<16x32xf32>
    %222 = arith.mulf %217, %221 : vector<16x32xf32>
    %223 = vector.broadcast %203 : vector<1x32xf32> to vector<16x32xf32>
    %224 = arith.mulf %222, %223 : vector<16x32xf32>
    %225 = vector.broadcast %204 : vector<1x32xf32> to vector<16x32xf32>
    %226 = arith.addf %224, %225 : vector<16x32xf32>
    %227 = vector.shape_cast %226 : vector<16x32xf32> to vector<8x2x32xf32>
    %cst_112 = arith.constant dense<0.000000e+00> : vector<2x32xf32>
    %228 = vector.multi_reduction <add>, %227, %cst_112 [0] : vector<8x2x32xf32> to vector<2x32xf32>
    %cst_113 = arith.constant 8.000000e+00 : f32
    %229 = vector.broadcast %cst_113 : f32 to vector<2x32xf32>
    %230 = arith.divf %228, %229 : vector<2x32xf32>
    %c0_114 = arith.constant 0 : index
    %c0_115 = arith.constant 0 : index
    %231 = vector.load %arg9[%c0_114, %c0_115] : memref<2x32xf32, #tpu.memory_space<vmem>>, vector<2x32xf32>
    tpu.vector_store %arg9[%c0_114, %c0_115], %230 {strides = array<i32>} : memref<2x32xf32, #tpu.memory_space<vmem>>, vector<2x32xf32>,
    return
  }
}

</mosaic_0001>

<bundles_post_ra>
// kernel: tpu_custom_call.1
= control target key start
LH: loop header
LB: loop body
LE: loop exit
PB: predicated region body
PF: predicated region fallthrough
CT: control target
= control target key end

     0   :  { %14 = vsyncpa [#allocation4], 0  ;;  %s1452_s0 = inlined_call_operand.hbm [shape: f32[8,2,16], index: 0, kind: input, shape index: {}]   ;;  %s1453_s1 = inlined_call_operand.hbm [shape: f32[16,32], index: 1, kind: input, shape index: {}]   ;;  %s1454_s2 = inlined_call_operand.vmem [shape: f32[1,32], index: 2, kind: input, shape index: {}]   ;;  %s1455_s3 = inlined_call_operand.hbm [shape: f32[2,8,8], index: 3, kind: input, shape index: {}]   ;;  %s1456_s4 = inlined_call_operand.hbm [shape: f32[2,32,40], index: 4, kind: input, shape index: {}]   ;;  %s1457_s5 = inlined_call_operand.vmem [shape: f32[2,40], index: 5, kind: input, shape index: {}]   ;;  %s1458_s6 = inlined_call_operand.hbm [shape: f32[2,8,32], index: 6, kind: input, shape index: {}]   ;;  %s1459_s7 = inlined_call_operand.vmem [shape: f32[1,32], index: 7, kind: input, shape index: {}]   ;;  %s1460_s8 = inlined_call_operand.vmem [shape: f32[1,32], index: 8, kind: input, shape index: {}]   ;;  %s1461_s9 = inlined_call_operand.hbm [shape: f32[2,32], index: 9, kind: output, shape index: {}]  }
   0x1   :  { %15 = vsyncpa [#allocation7], 0 }
   0x2   :  { %16 = vsyncpa [#allocation10], 0  ;;  %s35_s11 = sshll.u32 %s1453_s1, 4  ;;  %s36_s11 = int_to_ptr.hbm [resolvable:$true] %s35_s11 }
   0x3   :  { %17 = vsyncpa [#allocation5], 0  ;;  %s1236_s12 = smov [#allocation6]   ;;  %s63_s16 = sshll.u32 %s1456_s4, 4  ;;  %s64_s16 = int_to_ptr.hbm [resolvable:$true] %s63_s16 }
   0x4   :  { %s37_s13 = sshll.u32 %s1236_s12, 4  ;;  %s1237_s17 = smov 128   ;;  %s38_s13 = int_to_ptr.vmem [resolvable:$true] %s37_s13 }
   0x5   :  { %s1238_s18 = smov 8   ;;  %s1239_s19 = smov [#allocation9]  }
   0x6   :  { %43 = dma.hbm_to_vmem [thread:$0]  %s36_s11, 256, %s38_s13, [#allocation7], %s1237_s17, %s1237_s17, %s1238_s18  }
   0x7   :  { %s65_s20 = sshll.u32 %s1239_s19, 4  ;;  %s22_s22 = sshll.u32 %s1452_s0, 4  ;;  %s66_s20 = int_to_ptr.vmem [resolvable:$true] %s65_s20  ;;  %s23_s22 = int_to_ptr.hbm [resolvable:$true] %s22_s22 }
   0x8   :  { %71 = dma.hbm_to_vmem [thread:$0]  %s64_s16, 1024, %s66_s20, [#allocation10], %s1237_s17, %s1237_s17, %s1238_s18  }
   0x9   :  { %s1240_s4 = smov [#allocation3]   ;;  %s50_s26 = sshll.u32 %s1455_s3, 4  ;;  %s51_s26 = int_to_ptr.hbm [resolvable:$true] %s50_s26 }
   0xa   :  { %s24_s23 = sshll.u32 %s1240_s4, 4  ;;  %s1241_s27 = smov 32   ;;  %s25_s23 = int_to_ptr.vmem [resolvable:$true] %s24_s23 }
   0xb   :  { %s1242_s28 = smov 2   ;;  %s1243_s29 = smov [#allocation8]  }
   0xc   :  { %30 = dma.hbm_to_vmem [thread:$0]  %s23_s22, 256, %s25_s23, [#allocation4], %s1241_s27, %s1241_s27, %s1242_s28  }
   0xd   :  { %s52_s30 = sshll.u32 %s1243_s29, 4  ;;  %s78_s11 = sshll.u32 %s1458_s6, 4  ;;  %s53_s30 = int_to_ptr.vmem [resolvable:$true] %s52_s30  ;;  %s79_s11 = int_to_ptr.hbm [resolvable:$true] %s78_s11 }
   0xe   :  { %58 = dma.hbm_to_vmem [thread:$0]  %s51_s26, 256, %s53_s30, [#allocation7], %s1237_s17, %s1237_s17, %s1238_s18  }
   0xf   :  { %s1244_s12 = smov [#allocation11]  }
  0x10   :  { %s80_s13 = sshll.u32 %s1244_s12, 4  ;;  %s81_s13 = int_to_ptr.vmem [resolvable:$true] %s80_s13 }
  0x11   :  { %86 = dma.hbm_to_vmem [thread:$0]  %s79_s11, 256, %s81_s13, [#allocation10], %s1237_s17, %s1237_s17, %s1238_s18  }
  0x12   :  { %1228 = dma.done.wait [#allocation4], 256  }
  0x13   :  { %1229 = vsyncadd [#allocation4], 4294967040 }
  0x14   :  { %1230 = dma.done.wait [#allocation7], 512  }
  0x15   :  { %1231 = vsyncadd [#allocation7], 4294966784 }
  0x16   :  { %1232 = dma.done.wait [#allocation10], 1280  }
  0x17   :  { %1233 = vsyncadd [#allocation10], 4294966016  ;;  %v120_v0 = vld [vmem:[#allocation6 + $0x8] sm:$0xff]  ;;  %v119_v1 = vld [vmem:[#allocation6] sm:$0xff]  ;;  %vm150_vm0 = vcmask 130048   ;;  %vm178_vm1 = vcmask 261120  }
  0x18   :  { %v111_v2 = vld [vmem:[#allocation3] sm:$0x3]  ;;  %169 = vmatpush.msra.mxu0 %v120_v0  ;;  %v112_v3 = vld [vmem:[#allocation3 + $0x2] sm:$0x3]  ;;  %v113_v4 = vld [vmem:[#allocation3 + $0x4] sm:$0x3]  ;;  %1016 = vmatpush.msra.mxu1 %v120_v0 }
  0x19   :  { %v114_v5 = vld [vmem:[#allocation3 + $0x6] sm:$0x3]  ;;  %133 = vst [vmem:[#allocation1] ss:$4 sm:$0xff] %v111_v2  ;;  %v115_v6 = vld [vmem:[#allocation3 + $0x8] sm:$0x3] }
  0x1a   :  { %170 = vmatpush.msra.mxu0 %v119_v1  ;;  %135 = vst [vmem:[#allocation1 + $0x1] ss:$4 sm:$0xff] %v112_v3  ;;  %1017 = vmatpush.msra.mxu1 %v119_v1  ;;  %v116_v7 = vld [vmem:[#allocation3 + $0xa] sm:$0x3]  ;;  %v117_v8 = vld [vmem:[#allocation3 + $0xc] sm:$0x3] }
  0x1b   :  { %137 = vst [vmem:[#allocation1 + $0x2] ss:$4 sm:$0xff] %v113_v4  ;;  %v118_v9 = vld [vmem:[#allocation3 + $0xe] sm:$0x3]  ;;  %v1031_v12 = vld [vmem:[%s1454_s2] ss:$0 sm:$0xff] }
  0x1c   :  { %139 = vst [vmem:[#allocation1 + $0x3] ss:$4 sm:$0xff] %v114_v5  ;;  %v1245_v18 = vmov 32.0   ;;  %v233_v36 = vld [vmem:[#allocation9 + $0x18] sm:$0xff]  ;;  %v232_v37 = vld [vmem:[#allocation9 + $0x10] sm:$0xff]  ;;  %v231_v38 = vld [vmem:[#allocation9 + $0x8] sm:$0xff] }
  0x1d   :  { %141 = vst [vmem:[#allocation1 + $0x20] ss:$4 sm:$0xff] %v115_v6  ;;  %1036 = vrcp.f32 %v1245_v18  ;;  %254 = vmatpush.msrb.mxu1 %v233_v36  ;;  %v230_v39 = vld [vmem:[#allocation9] sm:$0xff]  ;;  %v279_v62 = vld [vmem:[#allocation8] sm:$0xff]  ;;  %v1032_v63 = vld [vmem:[%s1457_s5] ss:$0 sm:$0xff] }
  0x1e   :  { %143 = vst [vmem:[#allocation1 + $0x21] ss:$4 sm:$0xff] %v116_v7  ;;  %302 = vmatpush.msra.mxu2 %v279_v62  ;;  %328 = vmatpush.msra.mxu3 %v279_v62  ;;  %s1246_s15 = smov 120   ;;  %vm281_vm9 = vcmask 58368   ;;  %vm283_vm10 = vcmask 64512   ;;  %v474_v18 = vld [vmem:[#allocation11] sm:$0xff] }
  0x1f   :  { %145 = vst [vmem:[#allocation1 + $0x22] ss:$4 sm:$0xff] %v117_v8  ;;  %255 = vmatpush.msrb.mxu1 %v232_v37  ;;  %458 = vmatpush.msrb.mxu0 %v279_v62  ;;  %s980_s22 = sshll.u32 %s1461_s9, 4  ;;  %s981_s22 = int_to_ptr.hbm [resolvable:$true] %s980_s22 }
  0x20   :  { %147 = vst [vmem:[#allocation1 + $0x23] ss:$4 sm:$0xff] %v118_v9  ;;  %354 = vmatpush.msrb.mxu2 %v279_v62  ;;  %380 = vmatpush.msrb.mxu3 %v279_v62 }
  0x21   :  { %256 = vmatpush.msrb.mxu1 %v231_v38 }
  0x23   :  { %v148_v10 = vld.sshfl [vmem:[#allocation1] sm:$0xff pattern:$0x73625140]  ;;  %v1037_v20 = vpop.eup %1036  ;;  %257 = vmatpush.msrb.mxu1 %v230_v39 }
  0x24   :  { %992 = vmatmul.msk.f32.vlgmr.msra.gmra.mxu0 %vm150_vm0, %v148_v10  ;;  %v186_v21 = vmul.f32 32.0, %v1037_v20  ;;  %vm190_vm2 = vweird.f32 %v1037_v20 }
  0x26   :  { %v187_v22 = vsub.f32 1.0, %v186_v21 }
  0x27   :  { %v149_v11 = vld.sshfl [vmem:[#allocation1 + $0x20] sm:$0xff pattern:$0x73625140] }
  0x28   :  { %993 = vmatmul.msk.f32.vlgmr.msra.gmra.mxu1 %vm150_vm0, %v149_v11  ;;  %v188_v23 = vmul.f32 %v1037_v20, %v187_v22 }
  0x29   :  { %525 = vmatpush.msra.mxu1 %v474_v18 }
  0x2a   :  { %v189_v24 = vadd.f32 %v1037_v20, %v188_v23 }
  0x2c   :  { %v1337_v25 = vsel %vm190_vm2, %v1037_v20, %v189_v24 }
  0xa1   :  { %v172_v13 = vpop.f32.mrf.mxu0 }
  0xa2   :  { %v1329_v14 = vadd.f32 %v1031_v12, %v172_v13 }
  0xa4   :  { %v179_v15 = vsel %vm178_vm1, %v1329_v14, 0.0 }
  0xa5   :  { %180 = vadd.xlane.f32.xlu0 %v179_v15  ;;  %v175_v16 = vpop.f32.mrf.mxu1 }
  0xa6   :  { %v1333_v17 = vadd.f32 %v1031_v12, %v175_v16 }
  0xa8   :  { %v182_v19 = vsel %vm178_vm1, %v1333_v17, 0.0 }
  0xa9   :  { %183 = vadd.xlane.f32.xlu1 %v182_v19 }
 0x118   :  { %v181_v26 = vpop.xlane.xlu0 %180 }
 0x119   :  { %v192_v27 = vmul.f32 %v1337_v25, %v181_v26 }
 0x11b   :  { %v194_v28 = vsub.f32 %v1329_v14, %v192_v27 }
 0x11c   :  { %v184_v31 = vpop.xlane.xlu1 %183 }
 0x11d   :  { %v196_v29 = vmul.f32 %v194_v28, %v194_v28  ;;  %v193_v32 = vmul.f32 %v1337_v25, %v184_v31 }
 0x11f   :  { %v198_v30 = vsel %vm178_vm1, %v196_v29, 0.0  ;;  %v195_v33 = vsub.f32 %v1333_v17, %v193_v32 }
 0x120   :  { %199 = vadd.xlane.f32.xlu0 %v198_v30 }
 0x121   :  { %v197_v34 = vmul.f32 %v195_v33, %v195_v33 }
 0x123   :  { %v201_v35 = vsel %vm178_vm1, %v197_v34, 0.0 }
 0x124   :  { %202 = vadd.xlane.f32.xlu1 %v201_v35 }
 0x193   :  { %v200_v40 = vpop.xlane.xlu0 %199 }
 0x194   :  { %v204_v41 = vmul.f32 %v200_v40, %v1337_v25 }
 0x196   :  { %v206_v42 = vadd.f32 1e-05, %v204_v41 }
 0x197   :  { %v203_v51 = vpop.xlane.xlu1 %202 }
 0x198   :  { %1038 = vrsqrt.f32 %v206_v42  ;;  %vm214_vm4 = vweird.f32 %v206_v42  ;;  %v205_v52 = vmul.f32 %v203_v51, %v1337_v25 }
 0x19a   :  { %v207_v53 = vadd.f32 1e-05, %v205_v52 }
 0x19c   :  { %1040 = vrsqrt.f32 %v207_v53  ;;  %vm224_vm6 = vweird.f32 %v207_v53 }
 0x19e   :  { %v1039_v43 = vpop.eup %1038 }
 0x19f   :  { %v209_v44 = vmul.f32 %v1039_v43, %v206_v42  ;;  %vm215_vm3 = vweird.f32 %v1039_v43 }
 0x1a0   :  { %vm216_vm5 = vmor %vm214_vm4, %vm215_vm3 }
 0x1a1   :  { %v210_v45 = vmul.f32 %v1039_v43, %v209_v44  ;;  %v583_v44 = vld [vmem:[#allocation9 + $0x38] sm:$0xff] }
 0x1a2   :  { %v1041_v54 = vpop.eup %1040 }
 0x1a3   :  { %v211_v46 = vmul.f32 0.5, %v210_v45  ;;  %v219_v55 = vmul.f32 %v1041_v54, %v207_v53  ;;  %vm225_vm7 = vweird.f32 %v1041_v54  ;;  %v582_v45 = vld [vmem:[#allocation9 + $0x30] sm:$0xff] }
 0x1a4   :  { %vm226_vm8 = vmor %vm224_vm6, %vm225_vm7 }
 0x1a5   :  { %v212_v47 = vsub.f32 1.5, %v211_v46  ;;  %v220_v56 = vmul.f32 %v1041_v54, %v219_v55  ;;  %v581_v46 = vld [vmem:[#allocation9 + $0x28] sm:$0xff] }
 0x1a7   :  { %v213_v48 = vmul.f32 %v1039_v43, %v212_v47  ;;  %v221_v57 = vmul.f32 0.5, %v220_v56  ;;  %v580_v47 = vld [vmem:[#allocation9 + $0x20] sm:$0xff] }
 0x1a9   :  { %v217_v49 = vsel %vm216_vm5, %v1039_v43, %v213_v48  ;;  %v222_v58 = vsub.f32 1.5, %v221_v57 }
 0x1aa   :  { %v228_v50 = vmul.f32 %v217_v49, %v194_v28 }
 0x1ab   :  { %v223_v59 = vmul.f32 %v1041_v54, %v222_v58 }
 0x1ac   :  { %994 = vmatmul.msk.f32.vlgmr.msrb.gmra.mxu1 %vm178_vm1, %v228_v50 }
 0x1ad   :  { %v227_v60 = vsel %vm226_vm8, %v1041_v54, %v223_v59 }
 0x1ae   :  { %v229_v61 = vmul.f32 %v227_v60, %v195_v33 }
 0x1b4   :  { %995 = vmatmul.msk.f32.gmra.mxu1 %vm178_vm1, %v229_v61 }
 0x229   :  { %v259_v0 = vpop.f32.mrf.mxu1 }
 0x22a   :  { %v260_v1 = vadd.f32 %v1032_v63, %v259_v0  ;;  %v630_v0 = vld [vmem:[#allocation8 + $0x8] sm:$0xff] }
 0x22b   :  { %676 = vmatpush.msra.mxu0 %v630_v0  ;;  %751 = vmatpush.msrb.mxu1 %v630_v0 }
 0x22c   :  { %1042 = vtanh.f32 %v260_v1  ;;  %500 = vrot.lane.b32.xlu2 %v260_v1, %s1246_s15  ;;  %v267_v6 = vrot.slane %v260_v1, 2  ;;  %v268_v11 = vrot.slane %v260_v1, 4  ;;  %v269_v19 = vrot.slane %v260_v1, 6  ;;  %v1388_v1 = vld [vmem:[%s1457_s5 + $0x1] ss:$0 sm:$0xff] }
 0x231   :  { %v262_v4 = vpop.f32.mrf.mxu1 }
 0x232   :  { %v1043_v2 = vpop.eup %1042  ;;  %v1355_v5 = vadd.f32 %v1032_v63, %v262_v4 }
 0x233   :  { %282 = vst.msk [vmem:[#allocation2] sm:$0x3] %vm281_vm9, %v1043_v2  ;;  %996 = vmatmul.msk.f32.vlgmr.msra.gmra.mxu2 %vm283_vm10, %v1043_v2 }
 0x234   :  { %406 = vmatpush.msra.mxu2 %v279_v62  ;;  %502 = vrot.lane.b32.xlu1 %v1355_v5, %s1246_s15  ;;  %v270_v40 = vrot.slane %v1355_v5, 2  ;;  %v271_v59 = vrot.slane %v1355_v5, 4  ;;  %v272_v4 = vrot.slane %v1355_v5, 6 }
 0x23a   :  { %v466_v3 = vld [vmem:[#allocation2] sm:$0x3] }
 0x23b   :  { %483 = vst [vmem:[#allocation1] ss:$4 sm:$0xff] %v466_v3 }
 0x286   :  { %v501_v29 = vpop.permute.xlu2 %500 }
 0x2a6   :  { %v503_v18 = vpop.permute.xlu1 %502 }
 0x2b6   :  { %v304_v7 = vpop.f32.mrf.mxu2 }
 0x2b7   :  { %v305_v8 = vadd.f32 %v304_v7, %v267_v6 }
 0x2b9   :  { %1044 = vtanh.f32 %v305_v8 }
 0x2bf   :  { %v1045_v9 = vpop.eup %1044 }
 0x2c0   :  { %309 = vst.msk [vmem:[#allocation2 + $0x2] sm:$0x3] %vm281_vm9, %v1045_v9  ;;  %997 = vmatmul.msk.f32.vlgmr.msra.gmra.mxu3 %vm283_vm10, %v1045_v9 }
 0x2c1   :  { %432 = vmatpush.msra.mxu3 %v279_v62 }
 0x2c7   :  { %v467_v10 = vld [vmem:[#allocation2 + $0x2] sm:$0x3] }
 0x2c8   :  { %485 = vst [vmem:[#allocation1 + $0x1] ss:$4 sm:$0xff] %v467_v10 }
 0x343   :  { %v330_v12 = vpop.f32.mrf.mxu3 }
 0x344   :  { %v331_v13 = vadd.f32 %v330_v12, %v268_v11 }
 0x346   :  { %1046 = vtanh.f32 %v331_v13 }
 0x34c   :  { %v1047_v15 = vpop.eup %1046 }
 0x34d   :  { %335 = vst.msk [vmem:[#allocation2 + $0x4] sm:$0x3] %vm281_vm9, %v1047_v15  ;;  %998 = vmatmul.msk.f32.vlgmr.msrb.gmra.mxu2 %vm283_vm10, %v1047_v15 }
 0x34e   :  { %604 = vmatpush.msrb.mxu2 %v583_v44 }
 0x350   :  { %605 = vmatpush.msrb.mxu2 %v582_v45 }
 0x352   :  { %606 = vmatpush.msrb.mxu2 %v581_v46 }
 0x354   :  { %v468_v16 = vld [vmem:[#allocation2 + $0x4] sm:$0x3]  ;;  %607 = vmatpush.msrb.mxu2 %v580_v47 }
 0x355   :  { %487 = vst [vmem:[#allocation1 + $0x2] ss:$4 sm:$0xff] %v468_v16 }
 0x3d0   :  { %v356_v20 = vpop.f32.mrf.mxu2 }
 0x3d1   :  { %v357_v21 = vadd.f32 %v356_v20, %v269_v19 }
 0x3d3   :  { %1048 = vtanh.f32 %v357_v21 }
 0x3d9   :  { %v1049_v22 = vpop.eup %1048 }
 0x3da   :  { %361 = vst.msk [vmem:[#allocation2 + $0x6] sm:$0x3] %vm281_vm9, %v1049_v22  ;;  %999 = vmatmul.msk.f32.vlgmr.msrb.gmra.mxu3 %vm283_vm10, %v1049_v22 }
 0x3db   :  { %651 = vmatpush.msrb.mxu3 %v630_v0 }
 0x3e1   :  { %v469_v23 = vld [vmem:[#allocation2 + $0x6] sm:$0x3] }
 0x3e2   :  { %489 = vst [vmem:[#allocation1 + $0x3] ss:$4 sm:$0xff] %v469_v23 }
 0x3e9   :  { %v498_v24 = vld.sshfl [vmem:[#allocation1] sm:$0xff pattern:$0x73625140] }
 0x3ea   :  { %1003 = vmatmul.msk.f32.vlgmr.msra.gmra.mxu1 %vm283_vm10, %v498_v24 }
 0x45d   :  { %v382_v26 = vpop.f32.mrf.mxu3 }
 0x45e   :  { %v383_v27 = vadd.f32 %v382_v26, %v1355_v5 }
 0x460   :  { %1050 = vtanh.f32 %v383_v27 }
 0x466   :  { %v1051_v28 = vpop.eup %1050 }
 0x467   :  { %387 = vst.msk [vmem:[#allocation2 + $0x8] sm:$0x3] %vm281_vm9, %v1051_v28  ;;  %1000 = vmatmul.msk.f32.vlgmr.msra.gmra.mxu2 %vm283_vm10, %v1051_v28  ;;  %v527_v30 = vpop.f32.mrf.mxu1 }
 0x468   :  { %v528_v31 = vadd.f32 %v527_v30, %v501_v29  ;;  %776 = vmatpush.msra.mxu2 %v630_v0 }
 0x46a   :  { %v1370_v32 = vadd.f32 %v528_v31, %v1329_v14 }
 0x46c   :  { %v535_v33 = vsel %vm178_vm1, %v1370_v32, 0.0 }
 0x46d   :  { %536 = vadd.xlane.f32.xlu2 %v535_v33 }
 0x46e   :  { %v470_v34 = vld [vmem:[#allocation2 + $0x8] sm:$0x3] }
 0x46f   :  { %491 = vst [vmem:[#allocation1 + $0x20] ss:$4 sm:$0xff] %v470_v34 }
 0x4e0   :  { %v537_v35 = vpop.xlane.xlu2 %536 }
 0x4e1   :  { %v541_v36 = vmul.f32 %v537_v35, %v1337_v25  ;;  %v817_v35 = vld [vmem:[#allocation11 + $0x8] sm:$0xff] }
 0x4e3   :  { %v543_v37 = vsub.f32 %v1370_v32, %v541_v36 }
 0x4e5   :  { %v545_v38 = vmul.f32 %v543_v37, %v543_v37 }
 0x4e7   :  { %v547_v39 = vsel %vm178_vm1, %v545_v38, 0.0 }
 0x4e8   :  { %548 = vadd.xlane.f32.xlu0 %v547_v39 }
 0x4ea   :  { %v408_v41 = vpop.f32.mrf.mxu2 }
 0x4eb   :  { %v409_v14 = vadd.f32 %v408_v41, %v270_v40 }
 0x4ed   :  { %1052 = vtanh.f32 %v409_v14 }
 0x4f3   :  { %v1053_v42 = vpop.eup %1052 }
 0x4f4   :  { %413 = vst.msk [vmem:[#allocation2 + $0xa] sm:$0x3] %vm281_vm9, %v1053_v42  ;;  %1001 = vmatmul.msk.f32.vlgmr.msra.gmra.mxu3 %vm283_vm10, %v1053_v42 }
 0x4f5   :  { %701 = vmatpush.msra.mxu3 %v630_v0 }
 0x4fb   :  { %v471_v43 = vld [vmem:[#allocation2 + $0xa] sm:$0x3] }
 0x4fc   :  { %493 = vst [vmem:[#allocation1 + $0x21] ss:$4 sm:$0xff] %v471_v43 }
 0x55b   :  { %v549_v48 = vpop.xlane.xlu0 %548 }
 0x55c   :  { %v553_v49 = vmul.f32 %v549_v48, %v1337_v25 }
 0x55e   :  { %v555_v50 = vadd.f32 1e-05, %v553_v49 }
 0x560   :  { %1054 = vrsqrt.f32 %v555_v50  ;;  %vm563_vm12 = vweird.f32 %v555_v50 }
 0x566   :  { %v1055_v51 = vpop.eup %1054 }
 0x567   :  { %v558_v52 = vmul.f32 %v1055_v51, %v555_v50  ;;  %vm564_vm11 = vweird.f32 %v1055_v51 }
 0x568   :  { %vm565_vm13 = vmor %vm563_vm12, %vm564_vm11 }
 0x569   :  { %v559_v53 = vmul.f32 %v1055_v51, %v558_v52 }
 0x56b   :  { %v560_v54 = vmul.f32 0.5, %v559_v53 }
 0x56d   :  { %v561_v55 = vsub.f32 1.5, %v560_v54 }
 0x56f   :  { %v562_v56 = vmul.f32 %v1055_v51, %v561_v55 }
 0x571   :  { %v566_v57 = vsel %vm565_vm13, %v1055_v51, %v562_v56 }
 0x572   :  { %v577_v58 = vmul.f32 %v566_v57, %v543_v37 }
 0x574   :  { %1005 = vmatmul.msk.f32.vlgmr.msrb.gmra.mxu2 %vm178_vm1, %v577_v58 }
 0x577   :  { %v434_v60 = vpop.f32.mrf.mxu3 }
 0x578   :  { %v435_v61 = vadd.f32 %v434_v60, %v271_v59 }
 0x57a   :  { %1056 = vtanh.f32 %v435_v61 }
 0x580   :  { %v1057_v62 = vpop.eup %1056 }
 0x581   :  { %439 = vst.msk [vmem:[#allocation2 + $0xc] sm:$0x3] %vm281_vm9, %v1057_v62  ;;  %1002 = vmatmul.msk.f32.vlgmr.msrb.gmra.mxu0 %vm283_vm10, %v1057_v62 }
 0x582   :  { %726 = vmatpush.msrb.mxu0 %v630_v0 }
 0x588   :  { %v472_v63 = vld [vmem:[#allocation2 + $0xc] sm:$0x3] }
 0x589   :  { %495 = vst [vmem:[#allocation1 + $0x22] ss:$4 sm:$0xff] %v472_v63 }
 0x5f7   :  { %v609_v2 = vpop.f32.mrf.mxu2 }
 0x5f8   :  { %v610_v3 = vadd.f32 %v1388_v1, %v609_v2 }
 0x5fa   :  { %1058 = vtanh.f32 %v610_v3  ;;  %v617_v5 = vrot.slane %v610_v3, 2  ;;  %v618_v24 = vrot.slane %v610_v3, 4  ;;  %v619_v14 = vrot.slane %v610_v3, 6 }
 0x5fe   :  { %v460_v6 = vpop.f32.mrf.mxu0 }
 0x5ff   :  { %v461_v7 = vadd.f32 %v460_v6, %v272_v4 }
 0x600   :  { %v1059_v8 = vpop.eup %1058 }
 0x601   :  { %632 = vst.msk [vmem:[#allocation2] sm:$0x3] %vm281_vm9, %v1059_v8  ;;  %1060 = vtanh.f32 %v461_v7  ;;  %1007 = vmatmul.msk.f32.vlgmr.msrb.gmra.mxu3 %vm283_vm10, %v1059_v8 }
 0x602   :  { %801 = vmatpush.msrb.mxu3 %v630_v0 }
 0x607   :  { %v1061_v9 = vpop.eup %1060 }
 0x608   :  { %465 = vst.msk [vmem:[#allocation2 + $0xe] sm:$0x3] %vm281_vm9, %v1061_v9  ;;  %v808_v10 = vld [vmem:[#allocation2] sm:$0x3] }
 0x609   :  { %826 = vst [vmem:[#allocation1] ss:$4 sm:$0xff] %v808_v10 }
 0x60f   :  { %v473_v11 = vld [vmem:[#allocation2 + $0xe] sm:$0x3] }
 0x610   :  { %497 = vst [vmem:[#allocation1 + $0x23] ss:$4 sm:$0xff] %v473_v11 }
 0x617   :  { %v499_v12 = vld.sshfl [vmem:[#allocation1 + $0x20] sm:$0xff pattern:$0x73625140] }
 0x618   :  { %1004 = vmatmul.msk.f32.gmra.mxu1 %vm283_vm10, %v499_v12 }
 0x684   :  { %v653_v13 = vpop.f32.mrf.mxu3 }
 0x685   :  { %v654_v15 = vadd.f32 %v653_v13, %v617_v5 }
 0x687   :  { %1062 = vtanh.f32 %v654_v15 }
 0x68d   :  { %v1063_v16 = vpop.eup %1062 }
 0x68e   :  { %657 = vst.msk [vmem:[#allocation2 + $0x2] sm:$0x3] %vm281_vm9, %v1063_v16  ;;  %1008 = vmatmul.msk.f32.vlgmr.msra.gmra.mxu0 %vm283_vm10, %v1063_v16 }
 0x68f   :  { %868 = vmatpush.msra.mxu0 %v817_v35 }
 0x695   :  { %v530_v19 = vpop.f32.mrf.mxu1  ;;  %v809_v20 = vld [vmem:[#allocation2 + $0x2] sm:$0x3] }
 0x696   :  { %v531_v21 = vadd.f32 %v530_v19, %v503_v18  ;;  %828 = vst [vmem:[#allocation1 + $0x1] ss:$4 sm:$0xff] %v809_v20 }
 0x698   :  { %v1399_v22 = vadd.f32 %v531_v21, %v1333_v17 }
 0x69a   :  { %v538_v23 = vsel %vm178_vm1, %v1399_v22, 0.0 }
 0x69b   :  { %539 = vadd.xlane.f32.xlu0 %v538_v23 }
 0x70b   :  { %v678_v26 = vpop.f32.mrf.mxu0 }
 0x70c   :  { %v679_v27 = vadd.f32 %v678_v26, %v618_v24 }
 0x70e   :  { %1064 = vtanh.f32 %v679_v27  ;;  %v540_v28 = vpop.xlane.xlu0 %539 }
 0x70f   :  { %v542_v29 = vmul.f32 %v540_v28, %v1337_v25 }
 0x711   :  { %v544_v30 = vsub.f32 %v1399_v22, %v542_v29 }
 0x713   :  { %v546_v31 = vmul.f32 %v544_v30, %v544_v30 }
 0x714   :  { %v1065_v33 = vpop.eup %1064 }
 0x715   :  { %682 = vst.msk [vmem:[#allocation2 + $0x4] sm:$0x3] %vm281_vm9, %v1065_v33  ;;  %1009 = vmatmul.msk.f32.vlgmr.msra.gmra.mxu3 %vm283_vm10, %v1065_v33  ;;  %v550_v17 = vsel %vm178_vm1, %v546_v31, 0.0 }
 0x716   :  { %551 = vadd.xlane.f32.xlu0 %v550_v17 }
 0x71c   :  { %v810_v34 = vld [vmem:[#allocation2 + $0x4] sm:$0x3] }
 0x71d   :  { %830 = vst [vmem:[#allocation1 + $0x2] ss:$4 sm:$0xff] %v810_v34 }
 0x72a   :  { %843 = vrot.lane.b32.xlu0 %v610_v3, %s1246_s15 }
 0x789   :  { %v552_v36 = vpop.xlane.xlu0 %551 }
 0x78a   :  { %v554_v37 = vmul.f32 %v552_v36, %v1337_v25 }
 0x78c   :  { %v556_v38 = vadd.f32 1e-05, %v554_v37 }
 0x78e   :  { %1066 = vrsqrt.f32 %v556_v38  ;;  %vm573_vm15 = vweird.f32 %v556_v38 }
 0x794   :  { %v1067_v39 = vpop.eup %1066 }
 0x795   :  { %v568_v40 = vmul.f32 %v1067_v39, %v556_v38  ;;  %vm574_vm14 = vweird.f32 %v1067_v39 }
 0x796   :  { %vm575_vm0 = vmor %vm573_vm15, %vm574_vm14 }
 0x797   :  { %v569_v41 = vmul.f32 %v1067_v39, %v568_v40 }
 0x798   :  { %v703_v42 = vpop.f32.mrf.mxu3 }
 0x799   :  { %v570_v43 = vmul.f32 0.5, %v569_v41  ;;  %v704_v44 = vadd.f32 %v703_v42, %v619_v14  ;;  %v1034_v42 = vld [vmem:[%s1459_s7] ss:$0 sm:$0xff]  ;;  %s1248_s7 = smov [#allocation12]  }
 0x79b   :  { %v571_v45 = vsub.f32 1.5, %v570_v43  ;;  %1068 = vtanh.f32 %v704_v44 }
 0x79c   :  { %v844_v59 = vpop.permute.xlu0 %843 }
 0x79d   :  { %v572_v46 = vmul.f32 %v1067_v39, %v571_v45 }
 0x79f   :  { %v576_v47 = vsel %vm575_vm0, %v1067_v39, %v572_v46  ;;  %v1035_v46 = vld [vmem:[%s1460_s8] ss:$0 sm:$0xff]  ;;  %s978_s8 = sshll.u32 %s1248_s7, 4  ;;  %s979_s8 = int_to_ptr.vmem [resolvable:$true] %s978_s8 }
 0x7a0   :  { %v578_v48 = vmul.f32 %v576_v47, %v544_v30 }
 0x7a1   :  { %v1069_v49 = vpop.eup %1068 }
 0x7a2   :  { %707 = vst.msk [vmem:[#allocation2 + $0x6] sm:$0x3] %vm281_vm9, %v1069_v49  ;;  %1006 = vmatmul.msk.f32.gmra.mxu2 %vm178_vm1, %v578_v48  ;;  %1010 = vmatmul.msk.f32.vlgmr.msrb.gmra.mxu0 %vm283_vm10, %v1069_v49  ;;  %v1247_v49 = vmov 8.0  }
 0x7a9   :  { %v811_v50 = vld [vmem:[#allocation2 + $0x6] sm:$0x3] }
 0x7aa   :  { %832 = vst [vmem:[#allocation1 + $0x3] ss:$4 sm:$0xff] %v811_v50 }
 0x7b1   :  { %v841_v51 = vld.sshfl [vmem:[#allocation1] sm:$0xff pattern:$0x73625140] }
 0x7b2   :  { %1014 = vmatmul.msk.f32.vlgmr.msra.gmra.mxu0 %vm283_vm10, %v841_v51 }
 0x81f   :  { %v728_v54 = vpop.f32.mrf.mxu0 }
 0x825   :  { %v612_v52 = vpop.f32.mrf.mxu2 }
 0x826   :  { %v613_v53 = vadd.f32 %v1388_v1, %v612_v52 }
 0x828   :  { %v729_v55 = vadd.f32 %v728_v54, %v613_v53  ;;  %845 = vrot.lane.b32.xlu1 %v613_v53, %s1246_s15  ;;  %v620_v63 = vrot.slane %v613_v53, 2  ;;  %v621_v4 = vrot.slane %v613_v53, 4  ;;  %v622_v9 = vrot.slane %v613_v53, 6 }
 0x82a   :  { %1070 = vtanh.f32 %v729_v55 }
 0x82f   :  { %v870_v58 = vpop.f32.mrf.mxu0 }
 0x830   :  { %v1071_v56 = vpop.eup %1070  ;;  %v871_v60 = vadd.f32 %v870_v58, %v844_v59 }
 0x831   :  { %732 = vst.msk [vmem:[#allocation2 + $0x8] sm:$0x3] %vm281_vm9, %v1071_v56  ;;  %1011 = vmatmul.msk.f32.vlgmr.msrb.gmra.mxu1 %vm283_vm10, %v1071_v56 }
 0x832   :  { %v876_v61 = vadd.f32 %v871_v60, %v1370_v32 }
 0x834   :  { %v880_v62 = vsel %vm178_vm1, %v876_v61, 0.0 }
 0x838   :  { %v812_v57 = vld [vmem:[#allocation2 + $0x8] sm:$0x3] }
 0x839   :  { %834 = vst [vmem:[#allocation1 + $0x20] ss:$4 sm:$0xff] %v812_v57 }
 0x852   :  { %881 = vadd.xlane.f32.xlu1 %v880_v62 }
 0x89a   :  { %v846_v15 = vpop.permute.xlu1 %845 }
 0x8ae   :  { %v753_v0 = vpop.f32.mrf.mxu1 }
 0x8af   :  { %v754_v1 = vadd.f32 %v753_v0, %v620_v63 }
 0x8b1   :  { %1072 = vtanh.f32 %v754_v1 }
 0x8b7   :  { %v1073_v2 = vpop.eup %1072 }
 0x8b8   :  { %757 = vst.msk [vmem:[#allocation2 + $0xa] sm:$0x3] %vm281_vm9, %v1073_v2  ;;  %1012 = vmatmul.msk.f32.vlgmr.msra.gmra.mxu2 %vm283_vm10, %v1073_v2 }
 0x8bf   :  { %v813_v3 = vld [vmem:[#allocation2 + $0xa] sm:$0x3] }
 0x8c0   :  { %836 = vst [vmem:[#allocation1 + $0x21] ss:$4 sm:$0xff] %v813_v3 }
 0x8c5   :  { %v882_v16 = vpop.xlane.xlu1 %881 }
 0x8c6   :  { %v886_v19 = vmul.f32 %v882_v16, %v1337_v25 }
 0x8c8   :  { %v888_v23 = vsub.f32 %v876_v61, %v886_v19 }
 0x8ca   :  { %v890_v26 = vmul.f32 %v888_v23, %v888_v23 }
 0x8cc   :  { %v892_v27 = vsel %vm178_vm1, %v890_v26, 0.0 }
 0x93b   :  { %v778_v6 = vpop.f32.mrf.mxu2 }
 0x93c   :  { %v779_v7 = vadd.f32 %v778_v6, %v621_v4 }
 0x93e   :  { %1074 = vtanh.f32 %v779_v7 }
 0x944   :  { %v1075_v8 = vpop.eup %1074 }
 0x945   :  { %782 = vst.msk [vmem:[#allocation2 + $0xc] sm:$0x3] %vm281_vm9, %v1075_v8  ;;  %1013 = vmatmul.msk.f32.vlgmr.msrb.gmra.mxu3 %vm283_vm10, %v1075_v8 }
 0x94c   :  { %v814_v32 = vld [vmem:[#allocation2 + $0xc] sm:$0x3] }
 0x94d   :  { %838 = vst [vmem:[#allocation1 + $0x22] ss:$4 sm:$0xff] %v814_v32 }
 0x9c8   :  { %v803_v10 = vpop.f32.mrf.mxu3 }
 0x9c9   :  { %v804_v11 = vadd.f32 %v803_v10, %v622_v9 }
 0x9cb   :  { %1076 = vtanh.f32 %v804_v11 }
 0x9d1   :  { %v1077_v12 = vpop.eup %1076 }
 0x9d2   :  { %807 = vst.msk [vmem:[#allocation2 + $0xe] sm:$0x3] %vm281_vm9, %v1077_v12 }
 0x9d9   :  { %v815_v5 = vld [vmem:[#allocation2 + $0xe] sm:$0x3] }
 0x9da   :  { %840 = vst [vmem:[#allocation1 + $0x23] ss:$4 sm:$0xff] %v815_v5 }
 0x9e1   :  { %v842_v13 = vld.sshfl [vmem:[#allocation1 + $0x20] sm:$0xff pattern:$0x73625140] }
 0x9e2   :  { %1015 = vmatmul.msk.f32.gmra.mxu0 %vm283_vm10, %v842_v13 }
 0xa5f   :  { %v873_v18 = vpop.f32.mrf.mxu0 }
 0xa60   :  { %v874_v20 = vadd.f32 %v873_v18, %v846_v15 }
 0xa62   :  { %v877_v21 = vadd.f32 %v874_v20, %v1399_v22 }
 0xa64   :  { %v883_v24 = vsel %vm178_vm1, %v877_v21, 0.0 }
 0xa65   :  { %884 = vadd.xlane.f32.xlu2 %v883_v24 }
 0xa6d   :  { %893 = vadd.xlane.f32.xlu2 %v892_v27 }
 0xad8   :  { %v885_v28 = vpop.xlane.xlu2 %884 }
 0xad9   :  { %v887_v29 = vmul.f32 %v885_v28, %v1337_v25 }
 0xadb   :  { %v889_v30 = vsub.f32 %v877_v21, %v887_v29 }
 0xadd   :  { %v891_v31 = vmul.f32 %v889_v30, %v889_v30 }
 0xadf   :  { %v895_v33 = vsel %vm178_vm1, %v891_v31, 0.0  ;;  %vm948_vm1 = vcmask 254976  }
 0xae0   :  { %896 = vadd.xlane.f32.xlu0 %v895_v33  ;;  %v894_v17 = vpop.xlane.xlu2 %893 }
 0xae1   :  { %v898_v34 = vmul.f32 %v894_v17, %v1337_v25 }
 0xae3   :  { %v900_v22 = vadd.f32 1e-05, %v898_v34 }
 0xae5   :  { %1078 = vrsqrt.f32 %v900_v22  ;;  %vm908_vm3 = vweird.f32 %v900_v22 }
 0xaeb   :  { %v1079_v35 = vpop.eup %1078 }
 0xaec   :  { %v903_v36 = vmul.f32 %v1079_v35, %v900_v22  ;;  %vm909_vm2 = vweird.f32 %v1079_v35 }
 0xaed   :  { %vm910_vm4 = vmor %vm908_vm3, %vm909_vm2 }
 0xaee   :  { %v904_v37 = vmul.f32 %v1079_v35, %v903_v36 }
 0xaf0   :  { %v905_v38 = vmul.f32 0.5, %v904_v37 }
 0xaf2   :  { %v906_v39 = vsub.f32 1.5, %v905_v38 }
 0xaf4   :  { %v907_v40 = vmul.f32 %v1079_v35, %v906_v39 }
 0xaf6   :  { %v911_v41 = vsel %vm910_vm4, %v1079_v35, %v907_v40 }
 0xaf7   :  { %v922_v43 = vmul.f32 %v911_v41, %v888_v23 }
 0xaf9   :  { %v927_v47 = vmul.f32 %v1034_v42, %v922_v43 }
 0xafb   :  { %v932_v48 = vadd.f32 %v1035_v46, %v927_v47 }
 0xafd   :  { %v936_v52 = vrot.slane %v932_v48, 2  ;;  %v937_v57 = vrot.slane %v932_v48, 4  ;;  %v949_v58 = vsel %vm948_vm1, %v932_v48, 0.0  ;;  %v938_v0 = vrot.slane %v932_v48, 6 }
 0xaff   :  { %v950_v56 = vsel %vm948_vm1, %v936_v52, 0.0  ;;  %v952_v1 = vsel %vm948_vm1, %v937_v57, 0.0  ;;  %v954_v7 = vsel %vm948_vm1, %v938_v0, 0.0 }
 0xb00   :  { %v951_v61 = vadd.f32 %v950_v56, %v949_v58 }
 0xb02   :  { %v953_v3 = vadd.f32 %v952_v1, %v951_v61 }
 0xb04   :  { %v955_v32 = vadd.f32 %v954_v7, %v953_v3 }
 0xb53   :  { %v897_v14 = vpop.xlane.xlu0 %896 }
 0xb54   :  { %v899_v44 = vmul.f32 %v897_v14, %v1337_v25 }
 0xb56   :  { %v901_v45 = vadd.f32 1e-05, %v899_v44 }
 0xb58   :  { %1080 = vrsqrt.f32 %v901_v45  ;;  %vm918_vm6 = vweird.f32 %v901_v45 }
 0xb59   :  { %1082 = vrcp.f32 %v1247_v49 }
 0xb5e   :  { %v1081_v50 = vpop.eup %1080 }
 0xb5f   :  { %v913_v51 = vmul.f32 %v1081_v50, %v901_v45  ;;  %v1083_v54 = vpop.eup %1082  ;;  %vm919_vm5 = vweird.f32 %v1081_v50 }
 0xb60   :  { %v965_v59 = vmul.f32 8.0, %v1083_v54  ;;  %vm920_vm7 = vmor %vm918_vm6, %vm919_vm5  ;;  %vm969_vm8 = vweird.f32 %v1083_v54 }
 0xb61   :  { %v914_v53 = vmul.f32 %v1081_v50, %v913_v51 }
 0xb62   :  { %v966_v2 = vsub.f32 1.0, %v965_v59 }
 0xb63   :  { %v915_v55 = vmul.f32 0.5, %v914_v53 }
 0xb64   :  { %v967_v8 = vmul.f32 %v1083_v54, %v966_v2 }
 0xb65   :  { %v916_v25 = vsub.f32 1.5, %v915_v55 }
 0xb66   :  { %v968_v15 = vadd.f32 %v1083_v54, %v967_v8 }
 0xb67   :  { %v917_v60 = vmul.f32 %v1081_v50, %v916_v25 }
 0xb68   :  { %v970_v21 = vsel %vm969_vm8, %v1083_v54, %v968_v15 }
 0xb69   :  { %v921_v62 = vsel %vm920_vm7, %v1081_v50, %v917_v60 }
 0xb6a   :  { %v923_v63 = vmul.f32 %v921_v62, %v889_v30 }
 0xb6c   :  { %v928_v4 = vmul.f32 %v1034_v42, %v923_v63 }
 0xb6e   :  { %v933_v6 = vadd.f32 %v1035_v46, %v928_v4 }
 0xb70   :  { %v939_v9 = vrot.slane %v933_v6, 2  ;;  %v940_v10 = vrot.slane %v933_v6, 4  ;;  %v956_v11 = vsel %vm948_vm1, %v933_v6, 0.0  ;;  %v941_v5 = vrot.slane %v933_v6, 6 }
 0xb71   :  { %v957_v12 = vadd.f32 %v956_v11, %v955_v32 }
 0xb72   :  { %v958_v13 = vsel %vm948_vm1, %v939_v9, 0.0  ;;  %v960_v18 = vsel %vm948_vm1, %v940_v10, 0.0  ;;  %v962_v20 = vsel %vm948_vm1, %v941_v5, 0.0 }
 0xb73   :  { %v959_v16 = vadd.f32 %v958_v13, %v957_v12 }
 0xb75   :  { %v961_v19 = vadd.f32 %v960_v18, %v959_v16 }
 0xb77   :  { %v963_v23 = vadd.f32 %v962_v20, %v961_v19 }
 0xb79   :  { %v971_v24 = vmul.f32 %v970_v21, %v963_v23 }
 0xb7b   :  { %972 = vst.msk [vmem:[#allocation12] sm:$0x3] %vm948_vm1, %v971_v24 }
 0xb7c   :  { %983 = dma.vmem_to_hbm [thread:$0]  %s979_s8, 32, %s981_s22, [#allocation5]  }
 0xb7d   :  { %1234 = dma.done.wait [#allocation5], 32  }
 0xb7e   :  { %1235 = vsyncadd [#allocation5], 4294967264 }
 0xb7f   :  { %988 = vsyncpa [#allocation4], 1 }
 0xb80   :  { %989 = vsyncpa [#allocation7], 1 }
 0xb81   :  { %990 = vsyncpa [#allocation10], 1 }
 0xb82   :  { %991 = vsyncpa [#allocation5], 1 }

</bundles_post_ra>
